<compile_context>
chip_gen: v7x
topology: tpu7x:2x2x1
jax: 0.10.0
libtpu: 0.0.40
codegen_flags: <defaults>
</compile_context>

<pallas_src>
import jax
import jax.numpy as jnp
from jax.experimental import pallas as pl
from jax.experimental.pallas import tpu as pltpu


def _round_up(v: int, m: int) -> int:
    return (v + m - 1) // m * m


def gcn_kernel(a_ref, x_ref, w1_ref, b1_ref, w2_ref, b2_ref, w3_ref, b3_ref,
               o_ref, t_s, h1_s):
    """Fused 2-layer GCN forward.

    grid = (2, num_row_tiles); axis 0 = layer phase, axis 1 = A_hat row tile.
    Scratch:
      t_s  (N_pad, E_PAD) bf16 : per-layer feature transform (X@W1, then H1@W2),
                                 computed once per phase at row-tile 0.
      h1_s (N_pad, E_PAD) bf16 : full conv1 activation (consumed by phase 1).
    """
    phase = pl.program_id(0)
    i = pl.program_id(1)
    tn = a_ref.shape[0]                       # row-tile size (static)

    # ---- one-time per-phase feature transform into t_s ----------------------
    @pl.when((phase == 0) & (i == 0))
    def _():                                  # conv1: T = X @ W1
        xw1 = jnp.dot(x_ref[...], w1_ref[...], preferred_element_type=jnp.float32)
        t_s[...] = xw1.astype(t_s.dtype)

    @pl.when((phase == 1) & (i == 0))
    def _():                                  # conv2: T = H1 @ W2
        h1w2 = jnp.dot(h1_s[...], w2_ref[...], preferred_element_type=jnp.float32)
        t_s[...] = h1w2.astype(t_s.dtype)

    a_tile = a_ref[...]                       # (tn, N_pad) bf16 row tile of A_hat

    # ---- phase 0: H1 rows = relu(A_tile @ (X W1) + b1) ----------------------
    @pl.when(phase == 0)
    def _():
        h1 = jnp.dot(a_tile, t_s[...], preferred_element_type=jnp.float32) + b1_ref[...]
        h1 = jnp.maximum(h1, 0.0)
        # Dropout(p=0.5) -> identity in eval mode.
        row0 = pl.multiple_of(i * tn, tn)
        h1_s[pl.ds(row0, tn), :] = h1.astype(h1_s.dtype)

    # ---- phase 1: logits rows = relu(A_tile @ (H1 W2) + b2) @ W3 + b3 -------
    @pl.when(phase == 1)
    def _():
        h2 = jnp.dot(a_tile, t_s[...], preferred_element_type=jnp.float32) + b2_ref[...]
        h2 = jnp.maximum(h2, 0.0)
        # Dropout(p=0.5) -> identity in eval mode.
        o_ref[...] = (jnp.dot(h2.astype(w3_ref.dtype), w3_ref[...],
                              preferred_element_type=jnp.float32) + b3_ref[...])


def gcn_forward(a_hat, x, w1, b1, w2, b2, w3, b3, *, row_tile=256):
    """Full GCN forward. Shapes: a_hat [N,N], x [N,F], w1 [F,E], w2 [E,E], w3 [E,C]."""
    n, f = x.shape
    e = w1.shape[1]
    c = w3.shape[1]

    e_pad = _round_up(e, 128)                 # lane-dense hidden dim
    c_pad = _round_up(c, 128)                 # lane-dense class dim (dense output stores)
    # Row tile of A_hat: 256 is safe for v5e/v6e/v7x VMEM budgets (re-derive /
    # bump to 512 on v7x, 512+ on v6e for large N if profiling warrants).
    tn = min(row_tile, _round_up(n, 128))
    n_pad = _round_up(n, tn)
    nt = n_pad // tn

    f32, bf16 = jnp.float32, jnp.bfloat16

    # Heavy operands in bf16 (half the HBM/VMEM footprint, native MXU rate);
    # accumulation stays f32 inside the kernel. Zero-padding keeps semantics
    # exact: padded rows/cols of A_hat and X are zero, padded weight/bias
    # columns are zero, so padded output columns are zero and get sliced off.
    a_p = jnp.zeros((n_pad, n_pad), bf16).at[:n, :n].set(a_hat.astype(bf16))
    x_p = jnp.zeros((n_pad, f), bf16).at[:n, :].set(x.astype(bf16))
    w1_p = jnp.zeros((f, e_pad), bf16).at[:, :e].set(w1.astype(bf16))
    w2_p = jnp.zeros((e_pad, e_pad), bf16).at[:e, :e].set(w2.astype(bf16))
    w3_p = jnp.zeros((e_pad, c_pad), bf16).at[:e, :c].set(w3.astype(bf16))
    b1_p = jnp.zeros((1, e_pad), f32).at[:, :e].set(jnp.asarray(b1, f32).reshape(1, e))
    b2_p = jnp.zeros((1, e_pad), f32).at[:, :e].set(jnp.asarray(b2, f32).reshape(1, e))
    b3_p = jnp.zeros((1, c_pad), f32).at[:, :c].set(jnp.asarray(b3, f32).reshape(1, c))

    resident = lambda p, i: (0, 0)            # fetched once, stays in VMEM

    flops = 2 * (n_pad * f * e_pad            # X @ W1
                 + 2 * n_pad * n_pad * e_pad  # two A_hat aggregations
                 + n_pad * e_pad * e_pad      # H1 @ W2
                 + n_pad * e_pad * c_pad)     # linear head
    bytes_accessed = (2 * a_p.size * 2        # A_hat streamed once per phase (bf16)
                      + x_p.size * 2
                      + (w1_p.size + w2_p.size + w3_p.size) * 2
                      + (b1_p.size + b2_p.size + b3_p.size) * 4
                      + n_pad * c_pad * 4)

    grid_spec = pltpu.PrefetchScalarGridSpec(
        num_scalar_prefetch=0,
        grid=(2, nt),                          # (layer phase, A_hat row tile)
        in_specs=[
            pl.BlockSpec((tn, n_pad), lambda p, i: (i, 0)),   # A_hat: streamed row tiles
            pl.BlockSpec((n_pad, f), resident),               # X
            pl.BlockSpec((f, e_pad), resident),               # W1
            pl.BlockSpec((1, e_pad), resident),               # b1
            pl.BlockSpec((e_pad, e_pad), resident),           # W2
            pl.BlockSpec((1, e_pad), resident),               # b2
            pl.BlockSpec((e_pad, c_pad), resident),           # W3
            pl.BlockSpec((1, c_pad), resident),               # b3
        ],
        # (i*p) pins the output block at 0 during phase 0 (where the kernel does
        # not write it), so every logits tile is flushed to HBM exactly once,
        # carrying phase-1 data — no garbage writebacks, no double writes.
        out_specs=pl.BlockSpec((tn, c_pad), lambda p, i: (i * p, 0)),
        scratch_shapes=[
            pltpu.VMEM((n_pad, e_pad), bf16),   # t_s : per-layer feature transform
            pltpu.VMEM((n_pad, e_pad), bf16),   # h1_s: conv1 activations
        ],
    )

    out_pad = pl.pallas_call(
        gcn_kernel,
        out_shape=jax.ShapeDtypeStruct((n_pad, c_pad), jnp.float32),
        grid_spec=grid_spec,
        compiler_params=pltpu.CompilerParams(
            # Row-tile axis must stay "arbitrary": phase 1 consumes ALL of h1_s
            # (per-core VMEM scratch) produced by phase 0, so megacore sharding
            # of the row axis would break the inter-layer barrier.
            dimension_semantics=("arbitrary", "arbitrary"),
            vmem_limit_bytes=32 * 1024 * 1024,
        ),
        cost_estimate=pl.CostEstimate(flops=flops, transcendentals=0,
                                      bytes_accessed=bytes_accessed),
    )(a_p, x_p, w1_p, b1_p, w2_p, b2_p, w3_p, b3_p)

    return out_pad[:n, :c]


def build_normalized_adjacency(edge_index, num_nodes):
    """Dense D^-1/2 (A + I) D^-1/2 from edge_index [2, E] (glue, plain JAX)."""
    src, dst = edge_index[0], edge_index[1]
    a = jnp.zeros((num_nodes, num_nodes), jnp.float32)
    a = a.at[src, dst].set(1.0)
    a = a.at[dst, src].set(1.0)                          # undirected
    idx = jnp.arange(num_nodes)
    a = a.at[idx, idx].set(1.0)                          # self-loops: a[i,i] == 1 even if
                                                         # edge_index already contains (i,i)
    deg = jnp.sum(a, axis=1)
    d_inv_sqrt = jnp.where(deg > 0, jax.lax.rsqrt(deg), 0.0)
    return a * d_inv_sqrt[:, None] * d_inv_sqrt[None, :]


def glorot(key, shape):
    fan_in, fan_out = shape
    limit = jnp.sqrt(6.0 / (fan_in + fan_out))
    return jax.random.uniform(key, shape, jnp.float32, -limit, limit)


if __name__ == "__main__":
    # Small synthetic graph standing in for Cora (num_features / num_classes scaled down).
    N_NODES = 128
    N_FEATURES = 64
    EMBED = 16
    N_CLASSES = 8
    N_EDGES = 256

    key = jax.random.PRNGKey(0)
    k_x, k_e, k_w1, k_w2, k_w3 = jax.random.split(key, 5)

    # Node features (row-normalized like NormalizeFeatures()).
    x = jax.random.uniform(k_x, (N_NODES, N_FEATURES), jnp.float32)
    x = x / jnp.clip(jnp.sum(x, axis=1, keepdims=True), 1e-12)

    edge_index = jax.random.randint(k_e, (2, N_EDGES), 0, N_NODES, dtype=jnp.int32)
    a_hat = build_normalized_adjacency(edge_index, N_NODES)

    # Glorot weights, zero biases (matches PyG defaults).
    w1 = glorot(k_w1, (N_FEATURES, EMBED))
    b1 = jnp.zeros((EMBED,), jnp.float32)
    w2 = glorot(k_w2, (EMBED, EMBED))
    b2 = jnp.zeros((EMBED,), jnp.float32)
    w3 = glorot(k_w3, (EMBED, N_CLASSES))
    b3 = jnp.zeros((N_CLASSES,), jnp.float32)

    out = gcn_forward(a_hat, x, w1, b1, w2, b2, w3, b3)
    out = jax.block_until_ready(out)

    # Pure-JAX f32 reference (kernel runs A_hat/X/weights in bf16 with f32 accumulation,
    # so tolerances account for bf16 rounding of inputs/intermediates).
    h_ref = jnp.maximum(a_hat @ (x @ w1) + b1[None, :], 0.0)
    h_ref = jnp.maximum(a_hat @ (h_ref @ w2) + b2[None, :], 0.0)
    ref = h_ref @ w3 + b3[None, :]

    assert out.shape == (N_NODES, N_CLASSES)
    max_err = float(jnp.max(jnp.abs(out - ref)))
    assert jnp.allclose(out, ref, atol=1e-2, rtol=5e-2), f"max abs err = {max_err}"

    print("KERNEL_OK")
</pallas_src>

<mosaic_0001>
module attributes {stable_mosaic.version = 11 : i64} {
  func.func @gcn_kernel(%arg0: i32, %arg1: i32, %arg2: memref<128x128xbf16, #tpu.memory_space<vmem>>, %arg3: memref<128x64xbf16, #tpu.memory_space<vmem>>, %arg4: memref<64x128xbf16, #tpu.memory_space<vmem>>, %arg5: memref<1x128xf32, #tpu.memory_space<vmem>>, %arg6: memref<128x128xbf16, #tpu.memory_space<vmem>>, %arg7: memref<1x128xf32, #tpu.memory_space<vmem>>, %arg8: memref<128x128xbf16, #tpu.memory_space<vmem>>, %arg9: memref<1x128xf32, #tpu.memory_space<vmem>>, %arg10: memref<128x128xf32, #tpu.memory_space<vmem>>, %arg11: memref<128x128xbf16, #tpu.memory_space<vmem>>, %arg12: memref<128x128xbf16, #tpu.memory_space<vmem>>) attributes {dimension_semantics = [#tpu.dimension_semantics<arbitrary>, #tpu.dimension_semantics<arbitrary>], iteration_bounds = array<i64: 2, 1>, scalar_prefetch = 0 : i64, scratch_operands = 2 : i64, tpu.core_type = #tpu.core_type<tc>, window_params = [{transform_indices = @transform_0, window_bounds = array<i64: 128, 128>}, {pipeline_mode = #tpu.pipeline_mode<synchronous>, transform_indices = @transform_1, window_bounds = array<i64: 128, 64>}, {pipeline_mode = #tpu.pipeline_mode<synchronous>, transform_indices = @transform_2, window_bounds = array<i64: 64, 128>}, {pipeline_mode = #tpu.pipeline_mode<synchronous>, transform_indices = @transform_3, window_bounds = array<i64: 1, 128>}, {pipeline_mode = #tpu.pipeline_mode<synchronous>, transform_indices = @transform_4, window_bounds = array<i64: 128, 128>}, {pipeline_mode = #tpu.pipeline_mode<synchronous>, transform_indices = @transform_5, window_bounds = array<i64: 1, 128>}, {pipeline_mode = #tpu.pipeline_mode<synchronous>, transform_indices = @transform_6, window_bounds = array<i64: 128, 128>}, {pipeline_mode = #tpu.pipeline_mode<synchronous>, transform_indices = @transform_7, window_bounds = array<i64: 1, 128>}, {transform_indices = @transform_8, window_bounds = array<i64: 128, 128>}]} {
    %c0_i32 = arith.constant 0 : i32
    %0 = arith.cmpi eq, %arg0, %c0_i32 : i32
    %c0_i32_0 = arith.constant 0 : i32
    %1 = arith.cmpi eq, %arg1, %c0_i32_0 : i32
    %2 = arith.andi %0, %1 : i1
    %3 = arith.extui %2 : i1 to i32
    %c0_i32_1 = arith.constant 0 : i32
    %4 = arith.cmpi ne, %3, %c0_i32_1 : i32
    scf.if %4 {
      %c0_9 = arith.constant 0 : index
      %c0_10 = arith.constant 0 : index
      %17 = vector.load %arg3[%c0_9, %c0_10] : memref<128x64xbf16, #tpu.memory_space<vmem>>, vector<128x64xbf16>
      %c0_11 = arith.constant 0 : index
      %c0_12 = arith.constant 0 : index
      %18 = vector.load %arg4[%c0_11, %c0_12] : memref<64x128xbf16, #tpu.memory_space<vmem>>, vector<64x128xbf16>
      %cst = arith.constant dense<0.000000e+00> : vector<128x128xf32>
      %19 = tpu.matmul %17, %18, %cst {dimension_numbers = #tpu.dot_dimension_numbers<[1], [0], [0], [1], [0, 0, 1, 1], [], []>} : vector<128x64xbf16>, vector<64x128xbf16>, vector<128x128xf32> -> vector<128x128xf32>
      %20 = arith.truncf %19 : vector<128x128xf32> to vector<128x128xbf16>
      %c0_13 = arith.constant 0 : index
      %c0_14 = arith.constant 0 : index
      %21 = vector.load %arg11[%c0_13, %c0_14] : memref<128x128xbf16, #tpu.memory_space<vmem>>, vector<128x128xbf16>
      tpu.vector_store %arg11[%c0_13, %c0_14], %20 {strides = array<i32>} : memref<128x128xbf16, #tpu.memory_space<vmem>>, vector<128x128xbf16>,
    } else {
    }
    %c1_i32 = arith.constant 1 : i32
    %5 = arith.cmpi eq, %arg0, %c1_i32 : i32
    %c0_i32_2 = arith.constant 0 : i32
    %6 = arith.cmpi eq, %arg1, %c0_i32_2 : i32
    %7 = arith.andi %5, %6 : i1
    %8 = arith.extui %7 : i1 to i32
    %c0_i32_3 = arith.constant 0 : i32
    %9 = arith.cmpi ne, %8, %c0_i32_3 : i32
    scf.if %9 {
      %c0_9 = arith.constant 0 : index
      %c0_10 = arith.constant 0 : index
      %17 = vector.load %arg12[%c0_9, %c0_10] : memref<128x128xbf16, #tpu.memory_space<vmem>>, vector<128x128xbf16>
      %c0_11 = arith.constant 0 : index
      %c0_12 = arith.constant 0 : index
      %18 = vector.load %arg6[%c0_11, %c0_12] : memref<128x128xbf16, #tpu.memory_space<vmem>>, vector<128x128xbf16>
      %cst = arith.constant dense<0.000000e+00> : vector<128x128xf32>
      %19 = tpu.matmul %17, %18, %cst {dimension_numbers = #tpu.dot_dimension_numbers<[1], [0], [0], [1], [0, 0, 1, 1], [], []>} : vector<128x128xbf16>, vector<128x128xbf16>, vector<128x128xf32> -> vector<128x128xf32>
      %20 = arith.truncf %19 : vector<128x128xf32> to vector<128x128xbf16>
      %c0_13 = arith.constant 0 : index
      %c0_14 = arith.constant 0 : index
      %21 = vector.load %arg11[%c0_13, %c0_14] : memref<128x128xbf16, #tpu.memory_space<vmem>>, vector<128x128xbf16>
      tpu.vector_store %arg11[%c0_13, %c0_14], %20 {strides = array<i32>} : memref<128x128xbf16, #tpu.memory_space<vmem>>, vector<128x128xbf16>,
    } else {
    }
    %c0 = arith.constant 0 : index
    %c0_4 = arith.constant 0 : index
    %10 = vector.load %arg2[%c0, %c0_4] : memref<128x128xbf16, #tpu.memory_space<vmem>>, vector<128x128xbf16>
    %c0_i32_5 = arith.constant 0 : i32
    %11 = arith.cmpi eq, %arg0, %c0_i32_5 : i32
    %12 = arith.extui %11 : i1 to i32
    %c0_i32_6 = arith.constant 0 : i32
    %13 = arith.cmpi ne, %12, %c0_i32_6 : i32
    scf.if %13 {
      %c0_9 = arith.constant 0 : index
      %c0_10 = arith.constant 0 : index
      %17 = vector.load %arg11[%c0_9, %c0_10] : memref<128x128xbf16, #tpu.memory_space<vmem>>, vector<128x128xbf16>
      %cst = arith.constant dense<0.000000e+00> : vector<128x128xf32>
      %18 = tpu.matmul %10, %17, %cst {dimension_numbers = #tpu.dot_dimension_numbers<[1], [0], [0], [1], [0, 0, 1, 1], [], []>} : vector<128x128xbf16>, vector<128x128xbf16>, vector<128x128xf32> -> vector<128x128xf32>
      %c0_11 = arith.constant 0 : index
      %c0_12 = arith.constant 0 : index
      %19 = vector.load %arg5[%c0_11, %c0_12] : memref<1x128xf32, #tpu.memory_space<vmem>>, vector<1x128xf32>
      %20 = vector.broadcast %19 : vector<1x128xf32> to vector<128x128xf32>
      %21 = arith.addf %18, %20 : vector<128x128xf32>
      %cst_13 = arith.constant 0.000000e+00 : f32
      %22 = vector.broadcast %cst_13 : f32 to vector<128x128xf32>
      %23 = arith.maximumf %21, %22 : vector<128x128xf32>
      %c128_i32 = arith.constant 128 : i32
      %24 = arith.muli %arg1, %c128_i32 : i32
      %25 = tpu.assume_multiple %24, 128 : i32
      %26 = arith.truncf %23 : vector<128x128xf32> to vector<128x128xbf16>
      %27 = arith.index_cast %25 : i32 to index
      %c0_14 = arith.constant 0 : index
      %28 = vector.load %arg12[%27, %c0_14] : memref<128x128xbf16, #tpu.memory_space<vmem>>, vector<128x128xbf16>
      tpu.vector_store %arg12[%27, %c0_14], %26 {strides = array<i32>} : memref<128x128xbf16, #tpu.memory_space<vmem>>, vector<128x128xbf16>,
    } else {
    }
    %c1_i32_7 = arith.constant 1 : i32
    %14 = arith.cmpi eq, %arg0, %c1_i32_7 : i32
    %15 = arith.extui %14 : i1 to i32
    %c0_i32_8 = arith.constant 0 : i32
    %16 = arith.cmpi ne, %15, %c0_i32_8 : i32
    scf.if %16 {
      %c0_9 = arith.constant 0 : index
      %c0_10 = arith.constant 0 : index
      %17 = vector.load %arg11[%c0_9, %c0_10] : memref<128x128xbf16, #tpu.memory_space<vmem>>, vector<128x128xbf16>
      %cst = arith.constant dense<0.000000e+00> : vector<128x128xf32>
      %18 = tpu.matmul %10, %17, %cst {dimension_numbers = #tpu.dot_dimension_numbers<[1], [0], [0], [1], [0, 0, 1, 1], [], []>} : vector<128x128xbf16>, vector<128x128xbf16>, vector<128x128xf32> -> vector<128x128xf32>
      %c0_11 = arith.constant 0 : index
      %c0_12 = arith.constant 0 : index
      %19 = vector.load %arg7[%c0_11, %c0_12] : memref<1x128xf32, #tpu.memory_space<vmem>>, vector<1x128xf32>
      %20 = vector.broadcast %19 : vector<1x128xf32> to vector<128x128xf32>
      %21 = arith.addf %18, %20 : vector<128x128xf32>
      %cst_13 = arith.constant 0.000000e+00 : f32
      %22 = vector.broadcast %cst_13 : f32 to vector<128x128xf32>
      %23 = arith.maximumf %21, %22 : vector<128x128xf32>
      %24 = arith.truncf %23 : vector<128x128xf32> to vector<128x128xbf16>
      %c0_14 = arith.constant 0 : index
      %c0_15 = arith.constant 0 : index
      %25 = vector.load %arg8[%c0_14, %c0_15] : memref<128x128xbf16, #tpu.memory_space<vmem>>, vector<128x128xbf16>
      %cst_16 = arith.constant dense<0.000000e+00> : vector<128x128xf32>
      %26 = tpu.matmul %24, %25, %cst_16 {dimension_numbers = #tpu.dot_dimension_numbers<[1], [0], [0], [1], [0, 0, 1, 1], [], []>} : vector<128x128xbf16>, vector<128x128xbf16>, vector<128x128xf32> -> vector<128x128xf32>
      %c0_17 = arith.constant 0 : index
      %c0_18 = arith.constant 0 : index
      %27 = vector.load %arg9[%c0_17, %c0_18] : memref<1x128xf32, #tpu.memory_space<vmem>>, vector<1x128xf32>
      %28 = vector.broadcast %27 : vector<1x128xf32> to vector<128x128xf32>
      %29 = arith.addf %26, %28 : vector<128x128xf32>
      %c0_19 = arith.constant 0 : index
      %c0_20 = arith.constant 0 : index
      %30 = vector.load %arg10[%c0_19, %c0_20] : memref<128x128xf32, #tpu.memory_space<vmem>>, vector<128x128xf32>
      tpu.vector_store %arg10[%c0_19, %c0_20], %29 {strides = array<i32>} : memref<128x128xf32, #tpu.memory_space<vmem>>, vector<128x128xf32>,
    } else {
    }
    return
  }
  func.func @transform_0(%arg0: i32, %arg1: i32) -> (i32, i32) {
    %c0_i32 = arith.constant 0 : i32
    %c0_i32_0 = arith.constant 0 : i32
    return %arg1, %c0_i32 : i32, i32
  }
  func.func @transform_1(%arg0: i32, %arg1: i32) -> (i32, i32) {
    %c0_i32 = arith.constant 0 : i32
    %c0_i32_0 = arith.constant 0 : i32
    %c0_i32_1 = arith.constant 0 : i32
    return %c0_i32, %c0_i32_0 : i32, i32
  }
  func.func @transform_2(%arg0: i32, %arg1: i32) -> (i32, i32) {
    %c0_i32 = arith.constant 0 : i32
    %c0_i32_0 = arith.constant 0 : i32
    %c0_i32_1 = arith.constant 0 : i32
    return %c0_i32, %c0_i32_0 : i32, i32
  }
  func.func @transform_3(%arg0: i32, %arg1: i32) -> (i32, i32) {
    %c0_i32 = arith.constant 0 : i32
    %c0_i32_0 = arith.constant 0 : i32
    %c0_i32_1 = arith.constant 0 : i32
    return %c0_i32, %c0_i32_0 : i32, i32
  }
  func.func @transform_4(%arg0: i32, %arg1: i32) -> (i32, i32) {
    %c0_i32 = arith.constant 0 : i32
    %c0_i32_0 = arith.constant 0 : i32
    %c0_i32_1 = arith.constant 0 : i32
    return %c0_i32, %c0_i32_0 : i32, i32
  }
  func.func @transform_5(%arg0: i32, %arg1: i32) -> (i32, i32) {
    %c0_i32 = arith.constant 0 : i32
    %c0_i32_0 = arith.constant 0 : i32
    %c0_i32_1 = arith.constant 0 : i32
    return %c0_i32, %c0_i32_0 : i32, i32
  }
  func.func @transform_6(%arg0: i32, %arg1: i32) -> (i32, i32) {
    %c0_i32 = arith.constant 0 : i32
    %c0_i32_0 = arith.constant 0 : i32
    %c0_i32_1 = arith.constant 0 : i32
    return %c0_i32, %c0_i32_0 : i32, i32
  }
  func.func @transform_7(%arg0: i32, %arg1: i32) -> (i32, i32) {
    %c0_i32 = arith.constant 0 : i32
    %c0_i32_0 = arith.constant 0 : i32
    %c0_i32_1 = arith.constant 0 : i32
    return %c0_i32, %c0_i32_0 : i32, i32
  }
  func.func @transform_8(%arg0: i32, %arg1: i32) -> (i32, i32) {
    %0 = arith.muli %arg1, %arg0 : i32
    %c0_i32 = arith.constant 0 : i32
    %c0_i32_0 = arith.constant 0 : i32
    return %0, %c0_i32 : i32, i32
  }
}

</mosaic_0001>

<bundles_post_ra>
// kernel: tpu_custom_call.1
= control target key start
LH: loop header
LB: loop body
LE: loop exit
PB: predicated region body
PF: predicated region fallthrough
CT: control target
= control target key end

     0   :  { %13 = vsyncpa [#allocation5], 0  ;;  %s2379_s0 = inlined_call_operand.vmem [shape: bf16[128,128], index: 0, kind: input, shape index: {}]   ;;  %s2380_s1 = inlined_call_operand.vmem [shape: bf16[128,64], index: 1, kind: input, shape index: {}]   ;;  %s2381_s2 = inlined_call_operand.vmem [shape: bf16[64,128], index: 2, kind: input, shape index: {}]   ;;  %s2382_s3 = inlined_call_operand.vmem [shape: f32[1,128], index: 3, kind: input, shape index: {}]   ;;  %s2383_s4 = inlined_call_operand.hbm [shape: bf16[128,128], index: 4, kind: input, shape index: {}]   ;;  %s2384_s5 = inlined_call_operand.vmem [shape: f32[1,128], index: 5, kind: input, shape index: {}]   ;;  %s2385_s6 = inlined_call_operand.hbm [shape: bf16[128,128], index: 6, kind: input, shape index: {}]   ;;  %s2386_s7 = inlined_call_operand.vmem [shape: f32[1,128], index: 7, kind: input, shape index: {}]   ;;  %s2387_s8 = inlined_call_operand.hbm [shape: f32[128,128], index: 8, kind: output, shape index: {}]  }
   0x1   :  { %14 = vsyncpa [#allocation8], 0 }
   0x2   :  { %15 = vsyncpa [#allocation6], 0 }
   0x3   :  { %17 = vsyncpa [#allocation6 + $0x1], 0  ;;  %s2075_s27 = smov 0   ;;  %s2077_s28 = smov 0  }
   0x4   :  { %s2079_s29 = smov 0  }
   0x5 LB: > { %s1474_s30 = sadd.s32 4294967295, %s2021_s29   ;;  %s1475_s9 = sadd.s32 4294967294, %s2021_s29   ;;  %s2021_s29 = sphi %s2079_s29, %s23_s29   ;;  %s2017_s28 = sphi %s2077_s28, %s2398_s28   ;;  %s2013_s27 = sphi %s2075_s27, %s2397_s27  }
   0x6   : > { %s35_s10 = sadd.s32 1, %s2017_s28  ;;  %p1476_p0 = scmp.ge.s32.totalorder %s2021_s29, 1 }
   0x7   : > { %p37_p1 = scmp.ge.s32.totalorder %s35_s10, 2  ;;  %p241_p2 = scmp.lt.s32.totalorder %s2021_s29, 3 }
   0x8   : > { %p2097_p3 = scmp.eq.s32.totalorder %s1474_s30, 0  ;;  %s2023_s13 = smov [#allocation4]  }
   0x9   : > { %s2400_s10 = smov (%p37_p1, %s35_s10), 0  ;;  %p2103_p4 = pnand %p1476_p0, %p241_p2 }
   0xa   : > { %s2391_s11 = scalar_select %p2097_p3, 1, 0 }
   0xb   : > { %s2392_s12 = scalar_select %p2103_p4, 1, 0 }
   0xc   : > { %s271_s14 = sshll.u32 %s2023_s13, 4  ;;  %p1828_p5 = pneg %p2103_p4  ;;  %s272_s14 = int_to_ptr.vmem [resolvable:$true] %s271_s14 }
   0xd   : > { %s2024_s16 = smov [#allocation7]   ;;  %s1905_s20 = scalar_lea.hbm %s2383_s4, 1024 }
   0xe   : > { %p2111_p6 = pnand %p2097_p3, %p1828_p5  ;;  %s287_s17 = sshll.u32 %s2024_s16, 4  ;;  %s2115_s17 = int_to_ptr.vmem [resolvable:$true] %s287_s17 }
   0xf   : > { %p1906_p7 = scmp.ne.s32.totalorder %s2383_s4, %s1905_s20  ;;  %p1912_p11 = scmp.lt.u32.totalorder %s1905_s20, %s2383_s4 }
  0x10   : > { %p1907_p8 = pneg %p2111_p6 }
  0x12   : > { %p1908_p9 = pnand %p1907_p8, %p1906_p7 }
  0x14   : > { %p1909_p10 = pneg %p1908_p9 }
  0x16   : > { %p1914_p12 = pnand %p1912_p11, %p1909_p10 }
  0x18   : > { %1917 = shalt.err (!%p1914_p12)
}
  0x19   : > { %s1918_s25 = scalar_lea.vmem %s272_s14, 1024  ;;  %p1926_p2 = scmp.lt.s32.totalorder %s272_s14, %s272_s14 }
  0x1a   : > { %p1919_p13 = scmp.ne.s32.totalorder %s272_s14, %s1918_s25  ;;  %p1927_p5 = scmp.lt.s32.totalorder %s1918_s25, %s1918_s25 }
  0x1c   : > { %p1921_p0 = pnand %p1919_p13, %p1907_p8  ;;  %p1928_p3 = por %p1927_p5, %p1926_p2 }
  0x1e   : > { %p1922_p1 = pneg %p1921_p0 }
  0x20   : > { %p1929_p4 = pnand %p1928_p3, %p1922_p1 }
  0x22   : > { %1932 = shalt.err (!%p1929_p4)
}
  0x23   : > { %s2025_s26 = smov 64   ;;  %s2026_s13 = smov 4  }
  0x24   : > { %1831 = dma.hbm_to_vmem [thread:$0]  (!%p2111_p6), %s2383_s4, 1024, %s272_s14, [#allocation5], %s2025_s26, %s2025_s26, %s2026_s13  }
  0x25   : > { %s1933_s21 = scalar_lea.hbm %s2385_s6, 1024 }
  0x26   : > { %p1934_p7 = scmp.ne.s32.totalorder %s2385_s6, %s1933_s21  ;;  %p1940_p9 = scmp.lt.u32.totalorder %s1933_s21, %s2385_s6 }
  0x28   : > { %p1936_p3 = pnand %p1934_p7, %p1907_p8 }
  0x2a   : > { %p1937_p4 = pneg %p1936_p3 }
  0x2c   : > { %p1942_p10 = pnand %p1940_p9, %p1937_p4 }
  0x2e   : > { %1945 = shalt.err (!%p1942_p10)
}
  0x2f   : > { %s1946_s14 = scalar_lea.vmem %s2115_s17, 1024  ;;  %p1954_p0 = scmp.lt.s32.totalorder %s2115_s17, %s2115_s17 }
  0x30   : > { %p1947_p11 = scmp.ne.s32.totalorder %s2115_s17, %s1946_s14  ;;  %p1955_p1 = scmp.lt.s32.totalorder %s1946_s14, %s1946_s14 }
  0x32   : > { %p1949_p12 = pnand %p1947_p11, %p1907_p8  ;;  %p1956_p2 = por %p1955_p1, %p1954_p0 }
  0x34   : > { %p1950_p13 = pneg %p1949_p12 }
  0x36   : > { %p1957_p5 = pnand %p1956_p2, %p1950_p13 }
  0x38   : > { %1960 = shalt.err (!%p1957_p5)
}
  0x39   : > { %1834 = dma.hbm_to_vmem [thread:$0]  (!%p2111_p6), %s2385_s6, 1024, %s2115_s17, [#allocation8], %s2025_s26, %s2025_s26, %s2026_s13  }
  0x3a   : > { %p2394_p7 = scmp.ne.s32.totalorder %s2392_s12, 0 }
  0x3b   : > { %p2395_p3 = scmp.ne.s32.totalorder (!%p2394_p7), %s2391_s11, 0 }
  0x3c   : > { %306 = sbr.rel (%p2394_p7) target bundleno = 1365 (0x555), region = 52 }
  0x43   : > { %2000 = dma.done.wait (%p2395_p3), [#allocation5], 1024  }
  0x44   : > { %2002 = vsyncadd (%p2395_p3), [#allocation5], 4294966272 }
  0x45   : > { %2004 = dma.done.wait (%p2395_p3), [#allocation8], 1024  }
  0x46   : > { %2006 = vsyncadd (%p2395_p3), [#allocation8], 4294966272  ;;  %p353_p8 = scmp.eq.s32.totalorder %s2013_s27, 0 }
  0x47   : > { %v1877_v0 = vld [vmem:[%s2381_s2] sm:$0xff] (%p353_p8)   ;;  %v1878_v1 = vld [vmem:[%s2381_s2 + $0x8] sm:$0xff] (%p353_p8)   ;;  %v1879_v2 = vld [vmem:[%s2381_s2 + $0x10] sm:$0xff] (%p353_p8)   ;;  %vm447_vm0 = vcmask (%p353_p8), 523264  }
  0x48   : > { %358 = sbr.rel (!%p353_p8) target bundleno = 314 (0x13a), region = 64  ;;  %1624 = vmatprep.subr.bf16.mxu0 (%p353_p8), %v1877_v0  ;;  %1776 = vmatprep.subr.bf16.mxu1 (%p353_p8), %v1877_v0  ;;  %v1881_v3 = vld [vmem:[%s2380_s1] sm:$0xff] (%p353_p8)   ;;  %v1880_v5 = vld [vmem:[%s2381_s2 + $0x18] sm:$0xff] (%p353_p8)   ;;  %v1883_v6 = vld [vmem:[%s2380_s1 + $0x8] sm:$0xff] (%p353_p8)  }
  0x49   : > { %1625 = vmatpush3.bf16.msra.mxu0 (%p353_p8), %v1877_v0  ;;  %1780 = vmatpush3.bf16.msra.mxu1 (%p353_p8), %v1877_v0  ;;  %v1882_v4 = vld [vmem:[%s2380_s1 + $0x20] sm:$0xff] (%p353_p8)   ;;  %v1884_v7 = vld [vmem:[%s2380_s1 + $0x28] sm:$0xff] (%p353_p8)   ;;  %v1885_v8 = vld [vmem:[%s2380_s1 + $0x10] sm:$0xff] (%p353_p8)  }
  0x4a   : > { %1626 = vmatprep.subr.bf16.mxu0 (%p353_p8), %v1878_v1  ;;  %1777 = vmatprep.subr.bf16.mxu1 (%p353_p8), %v1878_v1  ;;  %v1886_v9 = vld [vmem:[%s2380_s1 + $0x30] sm:$0xff] (%p353_p8)   ;;  %v1887_v10 = vld [vmem:[%s2380_s1 + $0x18] sm:$0xff] (%p353_p8)  }
  0x4b   : > { %1632 = vmatprep.mubr.msk.bf16.mxu0 (%p353_p8), %vm447_vm0, %v1881_v3  ;;  %1640 = vmatprep.mubr.msk.bf16.mxu1 (%p353_p8), %vm447_vm0, %v1882_v4  ;;  %v1888_v11 = vld [vmem:[%s2380_s1 + $0x38] sm:$0xff] (%p353_p8)  }
  0x4d   : > { %1627 = vmatpush3.bf16.msra.mxu0 (%p353_p8), %v1878_v1  ;;  %1781 = vmatpush3.bf16.msra.mxu1 (%p353_p8), %v1878_v1 }
  0x4e   : > { %1628 = vmatprep.subr.bf16.mxu0 (%p353_p8), %v1879_v2  ;;  %1778 = vmatprep.subr.bf16.mxu1 (%p353_p8), %v1879_v2 }
  0x51   : > { %1629 = vmatpush3.bf16.msra.mxu0 %v1879_v2  ;;  %1782 = vmatpush3.bf16.msra.mxu1 %v1879_v2 }
  0x52   : > { %1630 = vmatprep.subr.bf16.mxu0 %v1880_v5  ;;  %1779 = vmatprep.subr.bf16.mxu1 %v1880_v5 }
  0x55   : > { %1631 = vmatpush3.bf16.msra.mxu0 %v1880_v5  ;;  %1783 = vmatpush3.bf16.msra.mxu1 %v1880_v5 }
  0x58   : > { %1633 = vmatmul.mubr.msk.bf16.vlgmr.msra.gmra.mrb[0].mxu0 %vm447_vm0, %v1883_v6  ;;  %1641 = vmatmul.mubr.msk.bf16.vlgmr.msra.gmra.mrb[0].mxu1 %vm447_vm0, %v1884_v7 }
  0x59   : > { %1636 = vmatprep.mubr.msk.bf16.mxu0 %vm447_vm0, %v1885_v8  ;;  %1644 = vmatprep.mubr.msk.bf16.mxu1 %vm447_vm0, %v1886_v9 }
  0x60   : > { %1637 = vmatmul.mubr.msk.bf16.gmra.mrb[4].mxu0 %vm447_vm0, %v1887_v10  ;;  %1645 = vmatmul.mubr.msk.bf16.gmra.mrb[4].mxu1 %vm447_vm0, %v1888_v11 }
 0x12b   : > { %v1634_v12 = vpop.f32.mrb[0].mxu0  ;;  %v1642_v13 = vpop.f32.mrb[0].mxu1 }
 0x12c   : > { %v506_v14 = vpop.f32.mrb[1].mxu0  ;;  %v538_v15 = vpop.f32.mrb[1].mxu1 }
 0x12d   : > { %v1635_v16 = vpop.f32.mrb[2].mxu0  ;;  %v1643_v17 = vpop.f32.mrb[2].mxu1 }
 0x12e   : > { %v570_v18 = vpack.c.bf16 %v1635_v16, %v1634_v12  ;;  %v574_v19 = vpack.c.bf16 %v1643_v17, %v1642_v13  ;;  %v509_v20 = vpop.f32.mrb[3].mxu0  ;;  %v541_v21 = vpop.f32.mrb[3].mxu1 }
 0x12f   : > { %v569_v22 = vpack.c.bf16 %v509_v20, %v506_v14  ;;  %v573_v23 = vpack.c.bf16 %v541_v21, %v538_v15 }
 0x130   : > { %578 = vst [vmem:[#allocation2 + $0x8] sm:$0xff] %v570_v18  ;;  %582 = vst [vmem:[#allocation2 + $0x28] sm:$0xff] %v574_v19 }
 0x131   : > { %577 = vst [vmem:[#allocation2] sm:$0xff] %v569_v22  ;;  %581 = vst [vmem:[#allocation2 + $0x20] sm:$0xff] %v573_v23 }
 0x133   : > { %v1638_v24 = vpop.f32.mrb[4].mxu0  ;;  %v1646_v25 = vpop.f32.mrb[4].mxu1 }
 0x134   : > { %v522_v26 = vpop.f32.mrb[5].mxu0  ;;  %v554_v27 = vpop.f32.mrb[5].mxu1 }
 0x135   : > { %v1639_v28 = vpop.f32.mrb[6].mxu0  ;;  %v1647_v29 = vpop.f32.mrb[6].mxu1 }
 0x136   : > { %v572_v30 = vpack.c.bf16 %v1639_v28, %v1638_v24  ;;  %v576_v31 = vpack.c.bf16 %v1647_v29, %v1646_v25  ;;  %v525_v32 = vpop.f32.mrb[7].mxu0  ;;  %v557_v33 = vpop.f32.mrb[7].mxu1 }
 0x137   : > { %v571_v34 = vpack.c.bf16 %v525_v32, %v522_v26  ;;  %v575_v35 = vpack.c.bf16 %v557_v33, %v554_v27 }
 0x138   : > { %580 = vst [vmem:[#allocation2 + $0x18] sm:$0xff] %v572_v30  ;;  %584 = vst [vmem:[#allocation2 + $0x38] sm:$0xff] %v576_v31 }
 0x139   : > { %579 = vst [vmem:[#allocation2 + $0x10] sm:$0xff] %v571_v34  ;;  %583 = vst [vmem:[#allocation2 + $0x30] sm:$0xff] %v575_v35 }
 0x13a PF: > { %p585_p6 = scmp.eq.s32.totalorder %s2013_s27, 1 }
 0x13b   : > { %v1889_v36 = vld [vmem:[#allocation4] sm:$0xff] (%p585_p6)   ;;  %v1890_v37 = vld [vmem:[#allocation4 + $0x8] sm:$0xff] (%p585_p6)   ;;  %v1891_v38 = vld [vmem:[#allocation4 + $0x10] sm:$0xff] (%p585_p6)  }
 0x13c   : > { %589 = sbr.rel (!%p585_p6) target bundleno = 574 (0x23e), region = 68  ;;  %1648 = vmatprep.subr.bf16.mxu0 (%p585_p6), %v1889_v36  ;;  %1784 = vmatprep.subr.bf16.mxu1 (%p585_p6), %v1889_v36  ;;  %v1892_v39 = vld [vmem:[#allocation4 + $0x18] sm:$0xff] (%p585_p6)   ;;  %v590_v40 = vld [vmem:[#allocation3] sm:$0xff] (%p585_p6)  ;;  %v1894_v43 = vld [vmem:[#allocation4 + $0x28] sm:$0xff] (%p585_p6)  }
 0x13d   : > { %1649 = vmatpush3.bf16.msra.mxu0 (%p585_p6), %v1889_v36  ;;  %1792 = vmatpush3.bf16.msra.mxu1 (%p585_p6), %v1889_v36  ;;  %v594_v41 = vld [vmem:[#allocation3 + $0x20] sm:$0xff] (%p585_p6)  ;;  %v1895_v44 = vld [vmem:[#allocation4 + $0x30] sm:$0xff] (%p585_p6)   ;;  %v1896_v45 = vld [vmem:[#allocation4 + $0x38] sm:$0xff] (%p585_p6)  }
 0x13e   : > { %1650 = vmatprep.subr.bf16.mxu0 (%p585_p6), %v1890_v37  ;;  %1785 = vmatprep.subr.bf16.mxu1 (%p585_p6), %v1890_v37  ;;  %v1893_v42 = vld [vmem:[#allocation4 + $0x20] sm:$0xff] (%p585_p6)   ;;  %v591_v46 = vld [vmem:[#allocation3 + $0x8] sm:$0xff] (%p585_p6)  ;;  %v592_v48 = vld [vmem:[#allocation3 + $0x10] sm:$0xff] (%p585_p6) }
 0x13f   : > { %1664 = vmatprep.mubr.bf16.mxu0 (%p585_p6), %v590_v40  ;;  %1672 = vmatprep.mubr.bf16.mxu1 (%p585_p6), %v594_v41  ;;  %v595_v47 = vld [vmem:[#allocation3 + $0x28] sm:$0xff] (%p585_p6)  ;;  %v596_v49 = vld [vmem:[#allocation3 + $0x30] sm:$0xff] (%p585_p6)  ;;  %v593_v50 = vld [vmem:[#allocation3 + $0x18] sm:$0xff] (%p585_p6) }
 0x140   : > { %v597_v51 = vld [vmem:[#allocation3 + $0x38] sm:$0xff] (%p585_p6) }
 0x141   : > { %1651 = vmatpush3.bf16.msra.mxu0 (%p585_p6), %v1890_v37  ;;  %1793 = vmatpush3.bf16.msra.mxu1 (%p585_p6), %v1890_v37 }
 0x142   : > { %1652 = vmatprep.subr.bf16.mxu0 (%p585_p6), %v1891_v38  ;;  %1786 = vmatprep.subr.bf16.mxu1 (%p585_p6), %v1891_v38 }
 0x145   : > { %1653 = vmatpush3.bf16.msra.mxu0 %v1891_v38  ;;  %1794 = vmatpush3.bf16.msra.mxu1 %v1891_v38 }
 0x146   : > { %1654 = vmatprep.subr.bf16.mxu0 %v1892_v39  ;;  %1787 = vmatprep.subr.bf16.mxu1 %v1892_v39 }
 0x149   : > { %1655 = vmatpush3.bf16.msra.mxu0 %v1892_v39  ;;  %1795 = vmatpush3.bf16.msra.mxu1 %v1892_v39 }
 0x14a   : > { %1656 = vmatprep.subr.bf16.mxu0 %v1893_v42  ;;  %1788 = vmatprep.subr.bf16.mxu1 %v1893_v42 }
 0x14d   : > { %1657 = vmatpush3.bf16.msra.mxu0 %v1893_v42  ;;  %1796 = vmatpush3.bf16.msra.mxu1 %v1893_v42 }
 0x14e   : > { %1658 = vmatprep.subr.bf16.mxu0 %v1894_v43  ;;  %1789 = vmatprep.subr.bf16.mxu1 %v1894_v43 }
 0x151   : > { %1659 = vmatpush3.bf16.msra.mxu0 %v1894_v43  ;;  %1797 = vmatpush3.bf16.msra.mxu1 %v1894_v43 }
 0x152   : > { %1660 = vmatprep.subr.bf16.mxu0 %v1895_v44  ;;  %1790 = vmatprep.subr.bf16.mxu1 %v1895_v44 }
 0x155   : > { %1661 = vmatpush3.bf16.msra.mxu0 %v1895_v44  ;;  %1798 = vmatpush3.bf16.msra.mxu1 %v1895_v44 }
 0x156   : > { %1662 = vmatprep.subr.bf16.mxu0 %v1896_v45  ;;  %1791 = vmatprep.subr.bf16.mxu1 %v1896_v45 }
 0x159   : > { %1663 = vmatpush3.bf16.msra.mxu0 %v1896_v45  ;;  %1799 = vmatpush3.bf16.msra.mxu1 %v1896_v45 }
 0x15c   : > { %1665 = vmatmul.mubr.bf16.vlgmr.msra.gmra.mrb[0].mxu0 %v591_v46  ;;  %1673 = vmatmul.mubr.bf16.vlgmr.msra.gmra.mrb[0].mxu1 %v595_v47 }
 0x15d   : > { %1668 = vmatprep.mubr.bf16.mxu0 %v592_v48  ;;  %1676 = vmatprep.mubr.bf16.mxu1 %v596_v49 }
 0x164   : > { %1669 = vmatmul.mubr.bf16.gmra.mrb[4].mxu0 %v593_v50  ;;  %1677 = vmatmul.mubr.bf16.gmra.mrb[4].mxu1 %v597_v51 }
 0x22f   : > { %v1666_v52 = vpop.f32.mrb[0].mxu0  ;;  %v1674_v53 = vpop.f32.mrb[0].mxu1 }
 0x230   : > { %v696_v54 = vpop.f32.mrb[1].mxu0  ;;  %v728_v55 = vpop.f32.mrb[1].mxu1 }
 0x231   : > { %v1667_v56 = vpop.f32.mrb[2].mxu0  ;;  %v1675_v57 = vpop.f32.mrb[2].mxu1 }
 0x232   : > { %v760_v58 = vpack.c.bf16 %v1667_v56, %v1666_v52  ;;  %v764_v59 = vpack.c.bf16 %v1675_v57, %v1674_v53  ;;  %v699_v60 = vpop.f32.mrb[3].mxu0  ;;  %v731_v61 = vpop.f32.mrb[3].mxu1 }
 0x233   : > { %v759_v62 = vpack.c.bf16 %v699_v60, %v696_v54  ;;  %v763_v63 = vpack.c.bf16 %v731_v61, %v728_v55 }
 0x234   : > { %768 = vst [vmem:[#allocation2 + $0x8] sm:$0xff] %v760_v58  ;;  %772 = vst [vmem:[#allocation2 + $0x28] sm:$0xff] %v764_v59 }
 0x235   : > { %767 = vst [vmem:[#allocation2] sm:$0xff] %v759_v62  ;;  %771 = vst [vmem:[#allocation2 + $0x20] sm:$0xff] %v763_v63 }
 0x237   : > { %v1670_v0 = vpop.f32.mrb[4].mxu0  ;;  %v1678_v1 = vpop.f32.mrb[4].mxu1 }
 0x238   : > { %v712_v2 = vpop.f32.mrb[5].mxu0  ;;  %v744_v3 = vpop.f32.mrb[5].mxu1 }
 0x239   : > { %v1671_v4 = vpop.f32.mrb[6].mxu0  ;;  %v1679_v5 = vpop.f32.mrb[6].mxu1 }
 0x23a   : > { %v762_v6 = vpack.c.bf16 %v1671_v4, %v1670_v0  ;;  %v766_v7 = vpack.c.bf16 %v1679_v5, %v1678_v1  ;;  %v715_v8 = vpop.f32.mrb[7].mxu0  ;;  %v747_v9 = vpop.f32.mrb[7].mxu1 }
 0x23b   : > { %v761_v10 = vpack.c.bf16 %v715_v8, %v712_v2  ;;  %v765_v11 = vpack.c.bf16 %v747_v9, %v744_v3 }
 0x23c   : > { %770 = vst [vmem:[#allocation2 + $0x18] sm:$0xff] %v762_v6  ;;  %774 = vst [vmem:[#allocation2 + $0x38] sm:$0xff] %v766_v7 }
 0x23d   : > { %769 = vst [vmem:[#allocation2 + $0x10] sm:$0xff] %v761_v10  ;;  %773 = vst [vmem:[#allocation2 + $0x30] sm:$0xff] %v765_v11 }
 0x23e PF: > { %v2223_v12 = vld [vmem:[%s2379_s0] sm:$0xf]  ;;  %v2228_v13 = vld [vmem:[%s2379_s0 + $0x4] sm:$0xf]  ;;  %v2233_v14 = vld [vmem:[%s2379_s0 + $0x8] sm:$0xf] }
 0x23f   : > { %v2238_v15 = vld [vmem:[%s2379_s0 + $0xc] sm:$0xf]  ;;  %v2243_v16 = vld [vmem:[%s2379_s0 + $0x10] sm:$0xf]  ;;  %v2248_v17 = vld [vmem:[%s2379_s0 + $0x14] sm:$0xf] }
 0x240   : > { %v2253_v18 = vld [vmem:[%s2379_s0 + $0x18] sm:$0xf]  ;;  %v2258_v19 = vld [vmem:[%s2379_s0 + $0x1c] sm:$0xf]  ;;  %v2263_v20 = vld [vmem:[%s2379_s0 + $0x20] sm:$0xf] }
 0x241   : > { %v2268_v21 = vld [vmem:[%s2379_s0 + $0x24] sm:$0xf]  ;;  %v2273_v22 = vld [vmem:[%s2379_s0 + $0x28] sm:$0xf]  ;;  %v2278_v23 = vld [vmem:[%s2379_s0 + $0x2c] sm:$0xf] }
 0x242   : > { %v2283_v24 = vld [vmem:[%s2379_s0 + $0x30] sm:$0xf]  ;;  %v2288_v25 = vld [vmem:[%s2379_s0 + $0x34] sm:$0xf]  ;;  %v2293_v26 = vld [vmem:[%s2379_s0 + $0x38] sm:$0xf] }
 0x243   : > { %v2298_v27 = vld [vmem:[%s2379_s0 + $0x3c] sm:$0xf]  ;;  %p1513_p4 = scmp.ne.s32.totalorder %s2013_s27, 0 }
 0x244   : > { %v794_v28 = vld [vmem:[#allocation2] sm:$0xff] (!%p1513_p4)  ;;  %v795_v29 = vld [vmem:[#allocation2 + $0x8] sm:$0xff] (!%p1513_p4)  ;;  %v1515_v30 = vcombine.low (!%p1513_p4), %v2223_v12, %v2228_v13  ;;  %v1519_v31 = vcombine.low (!%p1513_p4), %v2263_v20, %v2268_v21  ;;  %v796_v32 = vld [vmem:[#allocation2 + $0x10] sm:$0xff] (!%p1513_p4)  ;;  %v1516_v38 = vcombine.low (!%p1513_p4), %v2233_v14, %v2238_v15  ;;  %v1520_v39 = vcombine.low (!%p1513_p4), %v2273_v22, %v2278_v23 }
 0x245   : > { %793 = sbr.rel (%p1513_p4) target bundleno = 843 (0x34b), region = 72  ;;  %1680 = vmatprep.subr.bf16.mxu0 (!%p1513_p4), %v794_v28  ;;  %1800 = vmatprep.subr.bf16.mxu1 (!%p1513_p4), %v794_v28  ;;  %v797_v33 = vld [vmem:[#allocation2 + $0x18] sm:$0xff] (!%p1513_p4)  ;;  %v798_v34 = vld [vmem:[#allocation2 + $0x20] sm:$0xff] (!%p1513_p4)  ;;  %v799_v35 = vld [vmem:[#allocation2 + $0x28] sm:$0xff] (!%p1513_p4)  ;;  %v1517_v40 = vcombine.low (!%p1513_p4), %v2243_v16, %v2248_v17  ;;  %v1521_v41 = vcombine.low (!%p1513_p4), %v2283_v24, %v2288_v25  ;;  %v1518_v42 = vcombine.low (!%p1513_p4), %v2253_v18, %v2258_v19 }
 0x246   : > { %1681 = vmatpush3.bf16.msra.mxu0 (!%p1513_p4), %v794_v28  ;;  %1808 = vmatpush3.bf16.msra.mxu1 (!%p1513_p4), %v794_v28  ;;  %v800_v36 = vld [vmem:[#allocation2 + $0x30] sm:$0xff] (!%p1513_p4)  ;;  %v801_v37 = vld [vmem:[#allocation2 + $0x38] sm:$0xff] (!%p1513_p4)  ;;  %v1522_v43 = vcombine.low (!%p1513_p4), %v2293_v26, %v2298_v27  ;;  %v1514_v44 = vld [vmem:[%s2382_s3] ss:$0 sm:$0xff] (!%p1513_p4) }
 0x247   : > { %1682 = vmatprep.subr.bf16.mxu0 (!%p1513_p4), %v795_v29  ;;  %1801 = vmatprep.subr.bf16.mxu1 (!%p1513_p4), %v795_v29 }
 0x248   : > { %1696 = vmatprep.mubr.bf16.mxu0 (!%p1513_p4), %v1515_v30  ;;  %1704 = vmatprep.mubr.bf16.mxu1 (!%p1513_p4), %v1519_v31 }
 0x24a   : > { %1683 = vmatpush3.bf16.msra.mxu0 (!%p1513_p4), %v795_v29  ;;  %1809 = vmatpush3.bf16.msra.mxu1 (!%p1513_p4), %v795_v29 }
 0x24b   : > { %1684 = vmatprep.subr.bf16.mxu0 (!%p1513_p4), %v796_v32  ;;  %1802 = vmatprep.subr.bf16.mxu1 (!%p1513_p4), %v796_v32 }
 0x24e   : > { %1685 = vmatpush3.bf16.msra.mxu0 %v796_v32  ;;  %1810 = vmatpush3.bf16.msra.mxu1 %v796_v32 }
 0x24f   : > { %1686 = vmatprep.subr.bf16.mxu0 %v797_v33  ;;  %1803 = vmatprep.subr.bf16.mxu1 %v797_v33 }
 0x252   : > { %1687 = vmatpush3.bf16.msra.mxu0 %v797_v33  ;;  %1811 = vmatpush3.bf16.msra.mxu1 %v797_v33 }
 0x253   : > { %1688 = vmatprep.subr.bf16.mxu0 %v798_v34  ;;  %1804 = vmatprep.subr.bf16.mxu1 %v798_v34 }
 0x256   : > { %1689 = vmatpush3.bf16.msra.mxu0 %v798_v34  ;;  %1812 = vmatpush3.bf16.msra.mxu1 %v798_v34 }
 0x257   : > { %1690 = vmatprep.subr.bf16.mxu0 %v799_v35  ;;  %1805 = vmatprep.subr.bf16.mxu1 %v799_v35 }
 0x25a   : > { %1691 = vmatpush3.bf16.msra.mxu0 %v799_v35  ;;  %1813 = vmatpush3.bf16.msra.mxu1 %v799_v35 }
 0x25b   : > { %1692 = vmatprep.subr.bf16.mxu0 %v800_v36  ;;  %1806 = vmatprep.subr.bf16.mxu1 %v800_v36 }
 0x25e   : > { %1693 = vmatpush3.bf16.msra.mxu0 %v800_v36  ;;  %1814 = vmatpush3.bf16.msra.mxu1 %v800_v36 }
 0x25f   : > { %1694 = vmatprep.subr.bf16.mxu0 %v801_v37  ;;  %1807 = vmatprep.subr.bf16.mxu1 %v801_v37 }
 0x262   : > { %1695 = vmatpush3.bf16.msra.mxu0 %v801_v37  ;;  %1815 = vmatpush3.bf16.msra.mxu1 %v801_v37 }
 0x265   : > { %1697 = vmatmul.mubr.bf16.vlgmr.msra.gmra.mrb[0].mxu0 %v1516_v38  ;;  %1705 = vmatmul.mubr.bf16.vlgmr.msra.gmra.mrb[0].mxu1 %v1520_v39 }
 0x266   : > { %1700 = vmatprep.mubr.bf16.mxu0 %v1517_v40  ;;  %1708 = vmatprep.mubr.bf16.mxu1 %v1521_v41 }
 0x26d   : > { %1701 = vmatmul.mubr.bf16.gmra.mrb[4].mxu0 %v1518_v42  ;;  %1709 = vmatmul.mubr.bf16.gmra.mrb[4].mxu1 %v1522_v43 }
 0x338   : > { %v1698_v45 = vpop.f32.mrb[0].mxu0  ;;  %v1706_v46 = vpop.f32.mrb[0].mxu1 }
 0x339   : > { %v900_v47 = vadd.f32 %v1698_v45, %v1514_v44  ;;  %v932_v48 = vadd.f32 %v1706_v46, %v1514_v44  ;;  %v891_v49 = vpop.f32.mrb[1].mxu0  ;;  %v923_v50 = vpop.f32.mrb[1].mxu1 }
 0x33a   : > { %v892_v51 = vadd.f32 %v1514_v44, %v891_v49  ;;  %v924_v52 = vadd.f32 %v1514_v44, %v923_v50  ;;  %v1699_v53 = vpop.f32.mrb[2].mxu0  ;;  %v1707_v54 = vpop.f32.mrb[2].mxu1 }
 0x33b   : > { %v903_v55 = vadd.f32 %v1699_v53, %v1514_v44  ;;  %v935_v56 = vadd.f32 %v1707_v54, %v1514_v44  ;;  %v894_v57 = vpop.f32.mrb[3].mxu0  ;;  %v926_v58 = vpop.f32.mrb[3].mxu1  ;;  %v956_v61 = vmax.f32 %v900_v47, 0.0  ;;  %v964_v62 = vmax.f32 %v932_v48, 0.0 }
 0x33c   : > { %v895_v59 = vadd.f32 %v1514_v44, %v894_v57  ;;  %v927_v60 = vadd.f32 %v1514_v44, %v926_v58  ;;  %v954_v1 = vmax.f32 %v892_v51, 0.0  ;;  %v962_v2 = vmax.f32 %v924_v52, 0.0 }
 0x33d   : > { %v957_v63 = vmax.f32 %v903_v55, 0.0  ;;  %v965_v0 = vmax.f32 %v935_v56, 0.0 }
 0x33e   : > { %v955_v3 = vmax.f32 %v895_v59, 0.0  ;;  %v963_v4 = vmax.f32 %v927_v60, 0.0 }
 0x33f   : > { %v972_v5 = vpack.c.bf16 %v957_v63, %v956_v61  ;;  %v976_v6 = vpack.c.bf16 %v965_v0, %v964_v62 }
 0x340   : > { %v971_v7 = vpack.c.bf16 %v955_v3, %v954_v1  ;;  %v975_v8 = vpack.c.bf16 %v963_v4, %v962_v2  ;;  %v1702_v9 = vpop.f32.mrb[4].mxu0  ;;  %v1710_v10 = vpop.f32.mrb[4].mxu1 }
 0x341   : > { %984 = vst [vmem:[#allocation3 + $0x8] sm:$0xff] %v972_v5  ;;  %988 = vst [vmem:[#allocation3 + $0x28] sm:$0xff] %v976_v6  ;;  %v916_v11 = vadd.f32 %v1702_v9, %v1514_v44  ;;  %v948_v28 = vadd.f32 %v1710_v10, %v1514_v44  ;;  %v907_v29 = vpop.f32.mrb[5].mxu0  ;;  %v939_v30 = vpop.f32.mrb[5].mxu1 }
 0x342   : > { %983 = vst [vmem:[#allocation3] sm:$0xff] %v971_v7  ;;  %987 = vst [vmem:[#allocation3 + $0x20] sm:$0xff] %v975_v8  ;;  %v908_v31 = vadd.f32 %v1514_v44, %v907_v29  ;;  %v940_v32 = vadd.f32 %v1514_v44, %v939_v30  ;;  %v1703_v33 = vpop.f32.mrb[6].mxu0  ;;  %v1711_v34 = vpop.f32.mrb[6].mxu1 }
 0x343   : > { %v919_v35 = vadd.f32 %v1703_v33, %v1514_v44  ;;  %v951_v36 = vadd.f32 %v1711_v34, %v1514_v44  ;;  %v910_v37 = vpop.f32.mrb[7].mxu0  ;;  %v942_v38 = vpop.f32.mrb[7].mxu1  ;;  %v960_v41 = vmax.f32 %v916_v11, 0.0  ;;  %v968_v42 = vmax.f32 %v948_v28, 0.0 }
 0x344   : > { %v911_v39 = vadd.f32 %v1514_v44, %v910_v37  ;;  %v943_v40 = vadd.f32 %v1514_v44, %v942_v38  ;;  %v958_v46 = vmax.f32 %v908_v31, 0.0  ;;  %v966_v47 = vmax.f32 %v940_v32, 0.0 }
 0x345   : > { %v961_v43 = vmax.f32 %v919_v35, 0.0  ;;  %v969_v45 = vmax.f32 %v951_v36, 0.0 }
 0x346   : > { %v959_v48 = vmax.f32 %v911_v39, 0.0  ;;  %v967_v49 = vmax.f32 %v943_v40, 0.0 }
 0x347   : > { %v974_v50 = vpack.c.bf16 %v961_v43, %v960_v41  ;;  %v978_v51 = vpack.c.bf16 %v969_v45, %v968_v42 }
 0x348   : > { %v973_v52 = vpack.c.bf16 %v959_v48, %v958_v46  ;;  %v977_v53 = vpack.c.bf16 %v967_v49, %v966_v47 }
 0x349   : > { %986 = vst [vmem:[#allocation3 + $0x18] sm:$0xff] %v974_v50  ;;  %990 = vst [vmem:[#allocation3 + $0x38] sm:$0xff] %v978_v51 }
 0x34a   : > { %985 = vst [vmem:[#allocation3 + $0x10] sm:$0xff] %v973_v52  ;;  %989 = vst [vmem:[#allocation3 + $0x30] sm:$0xff] %v977_v53 }
 0x34b PF: > { %p1523_p9 = scmp.ne.s32.totalorder %s2013_s27, 1 }
 0x34c   : > { %v994_v44 = vld [vmem:[#allocation2] sm:$0xff] (!%p1523_p9)  ;;  %v995_v54 = vld [vmem:[#allocation2 + $0x8] sm:$0xff] (!%p1523_p9)  ;;  %v1525_v55 = vcombine.low (!%p1523_p9), %v2223_v12, %v2228_v13  ;;  %v996_v56 = vld [vmem:[#allocation2 + $0x10] sm:$0xff] (!%p1523_p9)  ;;  %v1526_v2 = vcombine.low (!%p1523_p9), %v2233_v14, %v2238_v15  ;;  %v1527_v3 = vcombine.low (!%p1523_p9), %v2243_v16, %v2248_v17  ;;  %v1528_v4 = vcombine.low (!%p1523_p9), %v2253_v18, %v2258_v19 }
 0x34d   : > { %993 = sbr.rel (%p1523_p9) target bundleno = 1341 (0x53d), region = 76  ;;  %1712 = vmatprep.subr.bf16.mxu0 (!%p1523_p9), %v994_v44  ;;  %v1897_v57 = vld [vmem:[#allocation7] sm:$0xff] (!%p1523_p9)   ;;  %v1898_v58 = vld [vmem:[#allocation7 + $0x8] sm:$0xff] (!%p1523_p9)   ;;  %v1899_v59 = vld [vmem:[#allocation7 + $0x10] sm:$0xff] (!%p1523_p9)   ;;  %v1529_v5 = vcombine.low (!%p1523_p9), %v2263_v20, %v2268_v21  ;;  %v1530_v6 = vcombine.low (!%p1523_p9), %v2273_v22, %v2278_v23  ;;  %v1531_v14 = vcombine.low (!%p1523_p9), %v2283_v24, %v2288_v25  ;;  %v1532_v15 = vcombine.low (!%p1523_p9), %v2293_v26, %v2298_v27 }
 0x34e   : > { %1713 = vmatpush3.bf16.msra.mxu0 (!%p1523_p9), %v994_v44  ;;  %1728 = vmatprep.mubr.bf16.mxu0 (!%p1523_p9), %v1525_v55  ;;  %v997_v60 = vld [vmem:[#allocation2 + $0x18] sm:$0xff] (!%p1523_p9)  ;;  %v998_v12 = vld [vmem:[#allocation2 + $0x20] sm:$0xff] (!%p1523_p9)  ;;  %v999_v62 = vld [vmem:[#allocation2 + $0x28] sm:$0xff] (!%p1523_p9) }
 0x34f   : > { %1714 = vmatprep.subr.bf16.mxu0 (!%p1523_p9), %v995_v54  ;;  %1744 = vmatprep.subr.bf16.mxu1 (!%p1523_p9), %v1897_v57  ;;  %v1900_v61 = vld [vmem:[#allocation7 + $0x18] sm:$0xff] (!%p1523_p9)   ;;  %v1901_v13 = vld [vmem:[#allocation7 + $0x20] sm:$0xff] (!%p1523_p9)   ;;  %v1902_v63 = vld [vmem:[#allocation7 + $0x28] sm:$0xff] (!%p1523_p9)  }
 0x350   : > { %1745 = vmatpush3.bf16.msra.mxu1 (!%p1523_p9), %v1897_v57  ;;  %v1000_v0 = vld [vmem:[#allocation2 + $0x30] sm:$0xff] (!%p1523_p9)  ;;  %v1001_v1 = vld [vmem:[#allocation2 + $0x38] sm:$0xff] (!%p1523_p9)  ;;  %v1524_v18 = vld [vmem:[%s2384_s5] ss:$0 sm:$0xff] (!%p1523_p9) }
 0x351   : > { %1746 = vmatprep.subr.bf16.mxu1 (!%p1523_p9), %v1898_v58  ;;  %v1903_v16 = vld [vmem:[#allocation7 + $0x30] sm:$0xff] (!%p1523_p9)   ;;  %v1904_v17 = vld [vmem:[#allocation7 + $0x38] sm:$0xff] (!%p1523_p9)  }
 0x352   : > { %1715 = vmatpush3.bf16.msra.mxu0 (!%p1523_p9), %v995_v54 }
 0x353   : > { %1716 = vmatprep.subr.bf16.mxu0 (!%p1523_p9), %v996_v56 }
 0x354   : > { %1747 = vmatpush3.bf16.msra.mxu1 %v1898_v58 }
 0x355   : > { %1748 = vmatprep.subr.bf16.mxu1 %v1899_v59 }
 0x356   : > { %1717 = vmatpush3.bf16.msra.mxu0 %v996_v56 }
 0x357   : > { %1718 = vmatprep.subr.bf16.mxu0 %v997_v60 }
 0x358   : > { %1749 = vmatpush3.bf16.msra.mxu1 %v1899_v59 }
 0x359   : > { %1750 = vmatprep.subr.bf16.mxu1 %v1900_v61 }
 0x35a   : > { %1719 = vmatpush3.bf16.msra.mxu0 %v997_v60 }
 0x35b   : > { %1720 = vmatprep.subr.bf16.mxu0 %v998_v12 }
 0x35c   : > { %1751 = vmatpush3.bf16.msra.mxu1 %v1900_v61 }
 0x35d   : > { %1752 = vmatprep.subr.bf16.mxu1 %v1901_v13 }
 0x35e   : > { %1721 = vmatpush3.bf16.msra.mxu0 %v998_v12 }
 0x35f   : > { %1722 = vmatprep.subr.bf16.mxu0 %v999_v62 }
 0x360   : > { %1753 = vmatpush3.bf16.msra.mxu1 %v1901_v13 }
 0x361   : > { %1754 = vmatprep.subr.bf16.mxu1 %v1902_v63 }
 0x362   : > { %1723 = vmatpush3.bf16.msra.mxu0 %v999_v62 }
 0x363   : > { %1724 = vmatprep.subr.bf16.mxu0 %v1000_v0 }
 0x364   : > { %1755 = vmatpush3.bf16.msra.mxu1 %v1902_v63 }
 0x365   : > { %1756 = vmatprep.subr.bf16.mxu1 %v1903_v16 }
 0x366   : > { %1725 = vmatpush3.bf16.msra.mxu0 %v1000_v0 }
 0x367   : > { %1726 = vmatprep.subr.bf16.mxu0 %v1001_v1 }
 0x368   : > { %1757 = vmatpush3.bf16.msra.mxu1 %v1903_v16 }
 0x369   : > { %1758 = vmatprep.subr.bf16.mxu1 %v1904_v17 }
 0x36a   : > { %1727 = vmatpush3.bf16.msra.mxu0 %v1001_v1 }
 0x36c   : > { %1759 = vmatpush3.bf16.msra.mxu1 %v1904_v17 }
 0x36d   : > { %1729 = vmatmul.mubr.bf16.vlgmr.msra.gmra.mrb[0].mxu0 %v1526_v2 }
 0x36e   : > { %1732 = vmatprep.mubr.bf16.mxu0 %v1527_v3 }
 0x375   : > { %1733 = vmatmul.mubr.bf16.gmra.mrb[4].mxu0 %v1528_v4  ;;  %v1533_v4 = vld [vmem:[%s2386_s7] ss:$0 sm:$0xff] }
 0x376   : > { %1736 = vmatprep.mubr.bf16.mxu0 %v1529_v5 }
 0x37d   : > { %1737 = vmatmul.mubr.bf16.gmra.mrb[8].mxu0 %v1530_v6 }
 0x37e   : > { %1740 = vmatprep.mubr.bf16.mxu0 %v1531_v14 }
 0x385   : > { %1741 = vmatmul.mubr.bf16.gmra.mrb[12].mxu0 %v1532_v15 }
 0x440   : > { %v1730_v19 = vpop.f32.mrb[0].mxu0 }
 0x441   : > { %v1100_v20 = vadd.f32 %v1730_v19, %v1524_v18  ;;  %v1091_v21 = vpop.f32.mrb[1].mxu0 }
 0x442   : > { %v1092_v22 = vadd.f32 %v1524_v18, %v1091_v21  ;;  %v1731_v23 = vpop.f32.mrb[2].mxu0 }
 0x443   : > { %v1103_v24 = vadd.f32 %v1731_v23, %v1524_v18  ;;  %v1094_v25 = vpop.f32.mrb[3].mxu0  ;;  %v1156_v26 = vmax.f32 %v1100_v20, 0.0 }
 0x444   : > { %v1095_v7 = vadd.f32 %v1524_v18, %v1094_v25  ;;  %v1154_v8 = vmax.f32 %v1092_v22, 0.0 }
 0x445   : > { %v1157_v27 = vmax.f32 %v1103_v24, 0.0 }
 0x446   : > { %v1155_v9 = vmax.f32 %v1095_v7, 0.0 }
 0x447   : > { %v1171_v10 = vpack.c.bf16 %v1157_v27, %v1156_v26 }
 0x448   : > { %v1734_v11 = vpop.f32.mrb[4].mxu0  ;;  %v1170_v28 = vpack.c.bf16 %v1155_v9, %v1154_v8 }
 0x449   : > { %v1116_v29 = vadd.f32 %v1734_v11, %v1524_v18  ;;  %v1107_v30 = vpop.f32.mrb[5].mxu0 }
 0x44a   : > { %v1108_v31 = vadd.f32 %v1524_v18, %v1107_v30  ;;  %v1735_v32 = vpop.f32.mrb[6].mxu0  ;;  %1760 = vmatprep.mubr.bf16.mxu1 %v1170_v28 }
 0x44b   : > { %v1119_v33 = vadd.f32 %v1735_v32, %v1524_v18  ;;  %v1110_v34 = vpop.f32.mrb[7].mxu0  ;;  %1761 = vmatmul.mubr.bf16.vlgmr.msra.gmra.mrb[0].mxu1 %v1171_v10  ;;  %v1160_v36 = vmax.f32 %v1116_v29, 0.0 }
 0x44c   : > { %v1111_v35 = vadd.f32 %v1524_v18, %v1110_v34  ;;  %v1158_v38 = vmax.f32 %v1108_v31, 0.0 }
 0x44d   : > { %v1161_v37 = vmax.f32 %v1119_v33, 0.0 }
 0x44e   : > { %v1159_v39 = vmax.f32 %v1111_v35, 0.0 }
 0x44f   : > { %v1173_v40 = vpack.c.bf16 %v1161_v37, %v1160_v36 }
 0x450   : > { %v1172_v41 = vpack.c.bf16 %v1159_v39, %v1158_v38  ;;  %v1738_v42 = vpop.f32.mrb[8].mxu0 }
 0x451   : > { %v1132_v43 = vadd.f32 %v1738_v42, %v1524_v18  ;;  %v1123_v45 = vpop.f32.mrb[9].mxu0 }
 0x452   : > { %v1124_v46 = vadd.f32 %v1524_v18, %v1123_v45  ;;  %v1739_v47 = vpop.f32.mrb[10].mxu0  ;;  %1764 = vmatprep.mubr.bf16.mxu1 %v1172_v41 }
 0x453   : > { %v1135_v48 = vadd.f32 %v1739_v47, %v1524_v18  ;;  %v1126_v49 = vpop.f32.mrb[11].mxu0  ;;  %1765 = vmatmul.mubr.bf16.gmra.mrb[4].mxu1 %v1173_v40  ;;  %v1164_v51 = vmax.f32 %v1132_v43, 0.0 }
 0x454   : > { %v1127_v50 = vadd.f32 %v1524_v18, %v1126_v49  ;;  %v1162_v53 = vmax.f32 %v1124_v46, 0.0 }
 0x455   : > { %v1165_v52 = vmax.f32 %v1135_v48, 0.0 }
 0x456   : > { %v1163_v44 = vmax.f32 %v1127_v50, 0.0 }
 0x457   : > { %v1175_v54 = vpack.c.bf16 %v1165_v52, %v1164_v51 }
 0x458   : > { %v1174_v55 = vpack.c.bf16 %v1163_v44, %v1162_v53  ;;  %v1742_v56 = vpop.f32.mrb[12].mxu0 }
 0x459   : > { %v1148_v57 = vadd.f32 %v1742_v56, %v1524_v18  ;;  %v1139_v58 = vpop.f32.mrb[13].mxu0 }
 0x45a   : > { %v1140_v59 = vadd.f32 %v1524_v18, %v1139_v58  ;;  %v1743_v60 = vpop.f32.mrb[14].mxu0  ;;  %1768 = vmatprep.mubr.bf16.mxu1 %v1174_v55 }
 0x45b   : > { %v1151_v61 = vadd.f32 %v1743_v60, %v1524_v18  ;;  %v1142_v12 = vpop.f32.mrb[15].mxu0  ;;  %1769 = vmatmul.mubr.bf16.gmra.mrb[8].mxu1 %v1175_v54  ;;  %v1168_v62 = vmax.f32 %v1148_v57, 0.0 }
 0x45c   : > { %v1143_v13 = vadd.f32 %v1524_v18, %v1142_v12  ;;  %v1166_v0 = vmax.f32 %v1140_v59, 0.0 }
 0x45d   : > { %v1169_v63 = vmax.f32 %v1151_v61, 0.0 }
 0x45e   : > { %v1167_v1 = vmax.f32 %v1143_v13, 0.0 }
 0x45f   : > { %v1177_v2 = vpack.c.bf16 %v1169_v63, %v1168_v62 }
 0x460   : > { %v1176_v3 = vpack.c.bf16 %v1167_v1, %v1166_v0 }
 0x462   : > { %1772 = vmatprep.mubr.bf16.mxu1 %v1176_v3 }
 0x463   : > { %1773 = vmatmul.mubr.bf16.gmra.mrb[12].mxu1 %v1177_v2 }
 0x51e   : > { %v1762_v5 = vpop.f32.mrb[0].mxu1 }
 0x51f   : > { %v1292_v6 = vadd.f32 %v1762_v5, %v1533_v4  ;;  %v1283_v14 = vpop.f32.mrb[1].mxu1 }
 0x520   : > { %v1284_v15 = vadd.f32 %v1533_v4, %v1283_v14  ;;  %v1763_v16 = vpop.f32.mrb[2].mxu1 }
 0x521   : > { %1348 = vst [vmem:[#allocation9 + $0x10] sm:$0xff] %v1292_v6  ;;  %v1295_v17 = vadd.f32 %v1763_v16, %v1533_v4  ;;  %v1286_v18 = vpop.f32.mrb[3].mxu1 }
 0x522   : > { %1346 = vst [vmem:[#allocation9] sm:$0xff] %v1284_v15  ;;  %v1287_v19 = vadd.f32 %v1533_v4, %v1286_v18 }
 0x523   : > { %1349 = vst [vmem:[#allocation9 + $0x18] sm:$0xff] %v1295_v17 }
 0x524   : > { %1347 = vst [vmem:[#allocation9 + $0x8] sm:$0xff] %v1287_v19 }
 0x526   : > { %v1766_v20 = vpop.f32.mrb[4].mxu1 }
 0x527   : > { %v1308_v21 = vadd.f32 %v1766_v20, %v1533_v4  ;;  %v1299_v22 = vpop.f32.mrb[5].mxu1 }
 0x528   : > { %v1300_v23 = vadd.f32 %v1533_v4, %v1299_v22  ;;  %v1767_v24 = vpop.f32.mrb[6].mxu1 }
 0x529   : > { %1352 = vst [vmem:[#allocation9 + $0x30] sm:$0xff] %v1308_v21  ;;  %v1311_v25 = vadd.f32 %v1767_v24, %v1533_v4  ;;  %v1302_v7 = vpop.f32.mrb[7].mxu1 }
 0x52a   : > { %1350 = vst [vmem:[#allocation9 + $0x20] sm:$0xff] %v1300_v23  ;;  %v1303_v26 = vadd.f32 %v1533_v4, %v1302_v7 }
 0x52b   : > { %1353 = vst [vmem:[#allocation9 + $0x38] sm:$0xff] %v1311_v25 }
 0x52c   : > { %1351 = vst [vmem:[#allocation9 + $0x28] sm:$0xff] %v1303_v26 }
 0x52e   : > { %v1770_v27 = vpop.f32.mrb[8].mxu1 }
 0x52f   : > { %v1324_v8 = vadd.f32 %v1770_v27, %v1533_v4  ;;  %v1315_v9 = vpop.f32.mrb[9].mxu1 }
 0x530   : > { %v1316_v10 = vadd.f32 %v1533_v4, %v1315_v9  ;;  %v1771_v11 = vpop.f32.mrb[10].mxu1 }
 0x531   : > { %1356 = vst [vmem:[#allocation9 + $0x50] sm:$0xff] %v1324_v8  ;;  %v1327_v28 = vadd.f32 %v1771_v11, %v1533_v4  ;;  %v1318_v29 = vpop.f32.mrb[11].mxu1 }
 0x532   : > { %1354 = vst [vmem:[#allocation9 + $0x40] sm:$0xff] %v1316_v10  ;;  %v1319_v30 = vadd.f32 %v1533_v4, %v1318_v29 }
 0x533   : > { %1357 = vst [vmem:[#allocation9 + $0x58] sm:$0xff] %v1327_v28 }
 0x534   : > { %1355 = vst [vmem:[#allocation9 + $0x48] sm:$0xff] %v1319_v30 }
 0x536   : > { %v1774_v31 = vpop.f32.mrb[12].mxu1 }
 0x537   : > { %v1340_v32 = vadd.f32 %v1774_v31, %v1533_v4  ;;  %v1331_v33 = vpop.f32.mrb[13].mxu1 }
 0x538   : > { %v1332_v34 = vadd.f32 %v1533_v4, %v1331_v33  ;;  %v1775_v35 = vpop.f32.mrb[14].mxu1 }
 0x539   : > { %1360 = vst [vmem:[#allocation9 + $0x70] sm:$0xff] %v1340_v32  ;;  %v1343_v36 = vadd.f32 %v1775_v35, %v1533_v4  ;;  %v1334_v37 = vpop.f32.mrb[15].mxu1 }
 0x53a   : > { %1358 = vst [vmem:[#allocation9 + $0x60] sm:$0xff] %v1332_v34  ;;  %v1335_v38 = vadd.f32 %v1533_v4, %v1334_v37 }
 0x53b   : > { %1361 = vst [vmem:[#allocation9 + $0x78] sm:$0xff] %v1343_v36 }
 0x53c   : > { %1359 = vst [vmem:[#allocation9 + $0x68] sm:$0xff] %v1335_v38 }
 0x53d PF: > { %p2345_p10 = scmp.eq.s32.totalorder %s1474_s30, 1  ;;  %s2027_s16 = smov [#allocation9]  }
 0x53e   : > { %s1377_s18 = sshll.u32 %s2027_s16, 4  ;;  %s1378_s18 = int_to_ptr.vmem [resolvable:$true] %s1377_s18 }
 0x53f   : > { %s1961_s15 = scalar_lea.vmem %s1378_s18, 2048  ;;  %s1967_s17 = scalar_lea.vmem %s1378_s18, 4096 }
 0x540   : > { %p1962_p11 = scmp.ne.s32.totalorder %s1378_s18, %s1961_s15  ;;  %p1968_p0 = scmp.lt.s32.totalorder %s1378_s18, %s1378_s18 }
 0x541   : > { %p1969_p1 = scmp.lt.s32.totalorder %s1967_s17, %s1961_s15 }
 0x542   : > { %p1963_p12 = pnand %p1962_p11, %p2345_p10 }
 0x543   : > { %p1970_p2 = por %p1969_p1, %p1968_p0 }
 0x544   : > { %p1964_p13 = pneg %p1963_p12 }
 0x546   : > { %p1971_p5 = pnand %p1970_p2, %p1964_p13 }
 0x548   : > { %1974 = shalt.err (!%p1971_p5)
}
 0x549   : > { %s1975_s26 = scalar_lea.hbm %s2387_s8, 2048 }
 0x54a   : > { %p1976_p7 = scmp.ne.s32.totalorder %s2387_s8, %s1975_s26  ;;  %p1981_p6 = scmp.lt.u32.totalorder %s1975_s26, %s2387_s8 }
 0x54c   : > { %p1977_p3 = pnand %p1976_p7, %p2345_p10 }
 0x54e   : > { %p1978_p8 = pneg %p1977_p3 }
 0x550   : > { %p1983_p4 = pnand %p1981_p6, %p1978_p8 }
 0x552   : > { %1986 = shalt.err (!%p1983_p4)
}
 0x553   : > { %s2028_s21 = smov 128   ;;  %s2029_s22 = smov 8  }
 0x554   : > { %1825 = dma.vmem_to_hbm [thread:$0]  (%p2345_p10), %s1378_s18, 2048, %s2387_s8, [#allocation6], %s2028_s21, %s2028_s21, %s2029_s22  }
 0x555 PF: > { %p1844_p9 = scmp.ge.s32.totalorder %s2021_s29, 2  ;;  %p1845_p11 = scmp.eq.s32.totalorder %s1475_s9, 1 }
 0x557   : > { %p1836_p12 = pnand %p1845_p11, %p1844_p9 }
 0x559   : > { %2008 = dma.done.wait (!%p1836_p12), [#allocation6], 2048  }
 0x55a   : > { %2010 = vsyncadd (!%p1836_p12), [#allocation6], 4294965248  ;;  %s23_s29 = sadd.s32 1, %s2021_s29   ;;  %s2397_s27 = smov %s2017_s28 }
 0x55b   : > { %p20_p13 = scmp.ge.s32.totalorder %s23_s29, 4   ;;  %s2398_s28 = smov %s2400_s10 }
 0x55d   :  { %22 = sbr.rel (!%p20_p13) target bundleno = 5 (0x5), region = 113 }
 0x564   :  { %1398 = vsyncpa [#allocation5], 1 }
 0x565   :  { %1400 = vsyncpa [#allocation5 + $0x1], 1 }
 0x566   :  { %1401 = vsyncpa [#allocation8], 1 }
 0x567   :  { %1402 = vsyncpa [#allocation6], 1 }
 0x568   :  { %1404 = vsyncpa [#allocation6 + $0x1], 1 }

</bundles_post_ra>
